<compile_context>
chip_gen: v7x
topology: tpu7x:2x2x1
jax: 0.10.0
libtpu: 0.0.40
codegen_flags: <defaults>
</compile_context>

<pallas_src>
import numpy as np
import jax
import jax.numpy as jnp
from jax.experimental import pallas as pl
from jax.experimental.pallas import tpu as pltpu

LANE = 128   # TPU lane width; all matmul outputs are padded to this many columns


def _silu(v):
    return v * jax.nn.sigmoid(v)


def locs_gnn_kernel(x_ref, ef_ref, gs_ref, gr_ref, scat_ref, inv_ref,
                    w1sr_ref, w1e_ref, b1_ref, w2_ref, b2_ref,
                    w3_ref, b3_ref, w4_ref, b4_ref,
                    x_out_ref, msg_out_ref):
    """One batch element of the GNNLayer forward (grid axis = batch, 'parallel')."""
    f32, bf16 = jnp.float32, jnp.bfloat16
    x = x_ref[...]                       # (N, H)  f32 node features
    ef = ef_ref[...]                     # (E, H)  f32 edge features
    n, h = x.shape

    xb = x.astype(bf16)
    eb = ef.astype(bf16)

    # message_fn layer 1, algebraically split:
    #   concat([x_send, x_recv, e]) @ W1
    #     == gather(x @ W1s, send) + gather(x @ W1r, recv) + e @ W1e
    # W1s / W1r fused into a single [H, 256] weight -> one 256-lane MXU matmul.
    p_sr = jnp.dot(xb, w1sr_ref[...], preferred_element_type=f32)     # (N, 256)
    p_s = p_sr[:, :LANE].astype(bf16)
    p_r = p_sr[:, LANE:].astype(bf16)
    p_e = jnp.dot(eb, w1e_ref[...], preferred_element_type=f32)       # (E, 128)

    # per-edge gather of the node projections via exact 0/1 bf16 one-hot matmuls
    h1 = _silu(jnp.dot(gs_ref[...], p_s, preferred_element_type=f32)
               + jnp.dot(gr_ref[...], p_r, preferred_element_type=f32)
               + p_e + b1_ref[...])                                    # (E, 128)

    # message_fn layer 2
    msg = _silu(jnp.dot(h1.astype(bf16), w2_ref[...],
                        preferred_element_type=f32) + b2_ref[...])     # (E, 128)

    # scatter(msg, recv_edges, dim=1, reduce='mean'):
    # exact 0/1 scatter matmul, then per-node 1/count applied as an f32 multiply.
    agg = jnp.dot(scat_ref[...], msg.astype(bf16),
                  preferred_element_type=f32) * inv_ref[...]           # (N, 128)

    # residual (res = Identity); pad x to 128 lanes inside VMEM (no host pad).
    xp = jnp.concatenate([x, jnp.zeros((n, LANE - h), f32)], axis=-1)
    x_new = xp + agg

    # update_fn: Linear(H, 2H) -> SiLU -> Linear(2H, H), plus residual
    u1 = _silu(jnp.dot(x_new.astype(bf16), w3_ref[...],
                       preferred_element_type=f32) + b3_ref[...])      # (N, 128)
    u2 = jnp.dot(u1.astype(bf16), w4_ref[...],
                 preferred_element_type=f32) + b4_ref[...]

    x_out_ref[...] = x_new + u2          # (N, 128)  lane-dense store
    msg_out_ref[...] = msg               # (E, 128)  lane-dense store


def prepare_graph_operators(send_edges, recv_edges, num_nodes):
    """Per-batch gather / scatter matrices from the (static) edge index.

    gs/gr/scat contain only 0/1 so they are exact in bf16; the scatter-mean
    reciprocal count stays in f32 and is applied on the VPU after the matmul.
    """
    send = np.asarray(send_edges)
    recv = np.asarray(recv_edges)
    E, N = int(send.shape[0]), num_nodes
    gs = np.zeros((E, N), np.float32)
    gs[np.arange(E), send] = 1.0                      # edge e <- node send[e]
    gr = np.zeros((E, N), np.float32)
    gr[np.arange(E), recv] = 1.0                      # edge e <- node recv[e]
    cnt = np.maximum(gr.sum(axis=0), 1.0)             # incoming-edge count per node
    inv_cnt = (1.0 / cnt).astype(np.float32)[:, None]  # [N, 1] f32
    return (jnp.asarray(gs, jnp.bfloat16),
            jnp.asarray(gr, jnp.bfloat16),
            jnp.asarray(gr.T, jnp.bfloat16),          # [N, E] 0/1 scatter matrix
            jnp.asarray(inv_cnt))


def prepare_params(params, hidden_size):
    """Split/fuse W1, zero-pad to 128 output lanes, cast weights to bf16."""
    w1, b1, w2, b2, w3, b3, w4, b4 = (np.asarray(p, np.float32) for p in params)
    H = hidden_size

    def padw(a, rows, cols):
        out = np.zeros((rows, cols), np.float32)
        out[:a.shape[0], :a.shape[1]] = a
        return out

    # fused send/recv projection weight: one [H, 256] matmul, cols 0:H = W1_send,
    # cols 128:128+H = W1_recv (padding lanes stay exactly zero -> silu(0)=0).
    w1sr = np.zeros((H, 2 * LANE), np.float32)
    w1sr[:, :H] = w1[0:H]
    w1sr[:, LANE:LANE + H] = w1[H:2 * H]

    def bf(a):
        return jnp.asarray(a, jnp.bfloat16)

    def fbias(a):
        out = np.zeros((1, LANE), np.float32)
        out[0, :a.shape[-1]] = a.reshape(-1)
        return jnp.asarray(out)                        # biases stay f32

    return dict(
        w1sr=bf(w1sr),
        w1e=bf(padw(w1[2 * H:3 * H], H, LANE)),
        b1=fbias(b1),
        w2=bf(padw(w2, LANE, LANE)), b2=fbias(b2),
        w3=bf(padw(w3, LANE, LANE)), b3=fbias(b3),
        w4=bf(padw(w4, LANE, LANE)), b4=fbias(b4),
    )


def make_locs_gnn_layer(send_edges, recv_edges, num_nodes, batch_size, hidden_size, params):
    B, N, H = batch_size, num_nodes, hidden_size
    E = int(np.asarray(send_edges).shape[0])

    gs, gr, scat, inv_cnt = prepare_graph_operators(send_edges, recv_edges, N)
    p = prepare_params(params, H)

    def per_batch(shape):
        nd = len(shape)
        return pl.BlockSpec((None,) + shape, lambda b, _nd=nd: (b,) + (0,) * _nd)

    def shared(shape):
        return pl.BlockSpec(shape, lambda b, _nd=len(shape): (0,) * _nd)

    # advisory cost hint (real, per-batch operand sizes; not the old kron sizes)
    flops = 2 * B * (N * H * 2 * LANE          # fused send/recv projection
                     + E * H * LANE            # edge projection
                     + 2 * E * N * LANE        # one-hot gathers
                     + E * LANE * LANE         # message layer 2
                     + N * E * LANE            # scatter-mean
                     + 2 * N * LANE * LANE)    # update_fn
    transcendentals = B * (2 * E + N) * LANE
    bytes_accessed = (4 * B * (N * H + E * H + N * LANE + E * LANE)      # x, ef, outs
                      + 2 * 3 * E * N + 4 * N                            # gs, gr, scat, 1/cnt
                      + 2 * (H * 2 * LANE + H * LANE + 3 * LANE * LANE)  # bf16 weights
                      + 4 * 4 * LANE)                                    # f32 biases

    call = pl.pallas_call(
        locs_gnn_kernel,
        out_shape=(jax.ShapeDtypeStruct((B, N, LANE), jnp.float32),
                   jax.ShapeDtypeStruct((B, E, LANE), jnp.float32)),
        grid=(B,),
        in_specs=[per_batch((N, H)), per_batch((E, H)),
                  shared((E, N)), shared((E, N)), shared((N, E)), shared((N, 1)),
                  shared((H, 2 * LANE)), shared((H, LANE)), shared((1, LANE)),
                  shared((LANE, LANE)), shared((1, LANE)),
                  shared((LANE, LANE)), shared((1, LANE)),
                  shared((LANE, LANE)), shared((1, LANE))],
        out_specs=(per_batch((N, LANE)), per_batch((E, LANE))),
        compiler_params=pltpu.CompilerParams(
            dimension_semantics=("parallel",)),        # shards batches on v7x's 2 TCs
        cost_estimate=pl.CostEstimate(flops=int(flops),
                                      transcendentals=int(transcendentals),
                                      bytes_accessed=int(bytes_accessed)),
    )

    def apply_padded(x, edge_attr):
        # lane-padded [., 128] outputs: a multi-layer LoCS GNN stack keeps this
        # layout between layers and slices the first H lanes only once at the end.
        return call(x, edge_attr, gs, gr, scat, inv_cnt,
                    p["w1sr"], p["w1e"], p["b1"], p["w2"], p["b2"],
                    p["w3"], p["b3"], p["w4"], p["b4"])

    def apply(x, edge_attr):
        x_out_p, msg_p = apply_padded(x, edge_attr)
        return x_out_p[..., :H], msg_p[..., :H]        # final slice (once)

    return jax.jit(apply)


def reference(x, edge_attr, send_edges, recv_edges, params):
    """Pure-JAX f32 reference mirroring the PyTorch GNNLayer forward."""
    w1, b1, w2, b2, w3, b3, w4, b4 = params
    B, N, H = x.shape
    edge_in = jnp.concatenate(
        [x[:, send_edges, :], x[:, recv_edges, :], edge_attr], axis=-1)
    h = jax.nn.silu(edge_in @ w1 + b1)
    msg = jax.nn.silu(h @ w2 + b2)
    agg = jnp.zeros((B, N, H), jnp.float32).at[:, recv_edges, :].add(msg)
    cnt = jnp.zeros((N,), jnp.float32).at[recv_edges].add(1.0)
    agg = agg / jnp.maximum(cnt, 1.0)[None, :, None]
    x_new = x + agg
    u = jax.nn.silu(x_new @ w3 + b3)
    x_out = x_new + (u @ w4 + b4)
    return x_out, msg


if __name__ == "__main__":
    B, N, H = 2, 8, 32          # batch, num_objects, hidden (== input_size)
    # Fully connected graph without self-loops (as in LoCS): E = N*(N-1) = 56
    send_np, recv_np = np.where(~np.eye(N, dtype=bool))
    send_edges = send_np.astype(np.int32)
    recv_edges = recv_np.astype(np.int32)
    E = int(send_edges.shape[0])

    key = jax.random.PRNGKey(0)
    keys = jax.random.split(key, 8)
    x = jax.random.normal(keys[0], (B, N, H), jnp.float32)
    edge_attr = jax.random.normal(keys[1], (B, E, H), jnp.float32)

    # Deterministic parameter init (message_fn, update_fn). res = Identity.
    def lin(k, fan_in, fan_out):
        bound = 1.0 / np.sqrt(fan_in)
        kw, kb = jax.random.split(k)
        w = jax.random.uniform(kw, (fan_in, fan_out), jnp.float32, -bound, bound)
        b = jax.random.uniform(kb, (1, fan_out), jnp.float32, -bound, bound)
        return w, b

    w1, b1 = lin(keys[2], 3 * H, H)        # message_fn layer 1
    w2, b2 = lin(keys[3], H, H)            # message_fn layer 2
    w3, b3 = lin(keys[4], H, 2 * H)        # update_fn layer 1
    w4, b4 = lin(keys[5], 2 * H, H)        # update_fn layer 2
    params = (w1, b1, w2, b2, w3, b3, w4, b4)

    layer = make_locs_gnn_layer(send_edges, recv_edges, N, B, H, params)
    x_out, msg_out = layer(x, edge_attr)
    x_out, msg_out = jax.block_until_ready((x_out, msg_out))

    x_ref, msg_ref = reference(x, edge_attr, send_edges, recv_edges, params)
    # bf16 MXU operands with f32 accumulation -> slightly relaxed tolerance vs f32 ref
    assert np.allclose(np.asarray(x_out), np.asarray(x_ref), atol=2e-2, rtol=2e-2)
    assert np.allclose(np.asarray(msg_out), np.asarray(msg_ref), atol=2e-2, rtol=2e-2)

    print("KERNEL_OK")
</pallas_src>

<mosaic_0001>
module attributes {stable_mosaic.version = 11 : i64} {
  func.func @locs_gnn_kernel(%arg0: i32, %arg1: memref<1x8x32xf32, #tpu.memory_space<vmem>>, %arg2: memref<1x56x32xf32, #tpu.memory_space<vmem>>, %arg3: memref<56x8xbf16, #tpu.memory_space<vmem>>, %arg4: memref<56x8xbf16, #tpu.memory_space<vmem>>, %arg5: memref<8x56xbf16, #tpu.memory_space<vmem>>, %arg6: memref<8x1xf32, #tpu.memory_space<vmem>>, %arg7: memref<32x256xbf16, #tpu.memory_space<vmem>>, %arg8: memref<32x128xbf16, #tpu.memory_space<vmem>>, %arg9: memref<1x128xf32, #tpu.memory_space<vmem>>, %arg10: memref<128x128xbf16, #tpu.memory_space<vmem>>, %arg11: memref<1x128xf32, #tpu.memory_space<vmem>>, %arg12: memref<128x128xbf16, #tpu.memory_space<vmem>>, %arg13: memref<1x128xf32, #tpu.memory_space<vmem>>, %arg14: memref<128x128xbf16, #tpu.memory_space<vmem>>, %arg15: memref<1x128xf32, #tpu.memory_space<vmem>>, %arg16: memref<1x8x128xf32, #tpu.memory_space<vmem>>, %arg17: memref<1x56x128xf32, #tpu.memory_space<vmem>>) attributes {dimension_semantics = [#tpu.dimension_semantics<parallel>], iteration_bounds = array<i64: 2>, scalar_prefetch = 0 : i64, scratch_operands = 0 : i64, tpu.core_type = #tpu.core_type<tc>, window_params = [{transform_indices = @transform_0, window_bounds = array<i64: 1, 8, 32>}, {transform_indices = @transform_1, window_bounds = array<i64: 1, 56, 32>}, {pipeline_mode = #tpu.pipeline_mode<synchronous>, transform_indices = @transform_2, window_bounds = array<i64: 56, 8>}, {pipeline_mode = #tpu.pipeline_mode<synchronous>, transform_indices = @transform_3, window_bounds = array<i64: 56, 8>}, {pipeline_mode = #tpu.pipeline_mode<synchronous>, transform_indices = @transform_4, window_bounds = array<i64: 8, 56>}, {pipeline_mode = #tpu.pipeline_mode<synchronous>, transform_indices = @transform_5, window_bounds = array<i64: 8, 1>}, {pipeline_mode = #tpu.pipeline_mode<synchronous>, transform_indices = @transform_6, window_bounds = array<i64: 32, 256>}, {pipeline_mode = #tpu.pipeline_mode<synchronous>, transform_indices = @transform_7, window_bounds = array<i64: 32, 128>}, {pipeline_mode = #tpu.pipeline_mode<synchronous>, transform_indices = @transform_8, window_bounds = array<i64: 1, 128>}, {pipeline_mode = #tpu.pipeline_mode<synchronous>, transform_indices = @transform_9, window_bounds = array<i64: 128, 128>}, {pipeline_mode = #tpu.pipeline_mode<synchronous>, transform_indices = @transform_10, window_bounds = array<i64: 1, 128>}, {pipeline_mode = #tpu.pipeline_mode<synchronous>, transform_indices = @transform_11, window_bounds = array<i64: 128, 128>}, {pipeline_mode = #tpu.pipeline_mode<synchronous>, transform_indices = @transform_12, window_bounds = array<i64: 1, 128>}, {pipeline_mode = #tpu.pipeline_mode<synchronous>, transform_indices = @transform_13, window_bounds = array<i64: 128, 128>}, {pipeline_mode = #tpu.pipeline_mode<synchronous>, transform_indices = @transform_14, window_bounds = array<i64: 1, 128>}, {transform_indices = @transform_15, window_bounds = array<i64: 1, 8, 128>}, {transform_indices = @transform_16, window_bounds = array<i64: 1, 56, 128>}]} {
    %c0 = arith.constant 0 : index
    %c0_0 = arith.constant 0 : index
    %c0_1 = arith.constant 0 : index
    %0 = vector.load %arg1[%c0, %c0_0, %c0_1] : memref<1x8x32xf32, #tpu.memory_space<vmem>>, vector<1x8x32xf32>
    %1 = vector.shape_cast %0 : vector<1x8x32xf32> to vector<8x32xf32>
    %c0_2 = arith.constant 0 : index
    %c0_3 = arith.constant 0 : index
    %c0_4 = arith.constant 0 : index
    %2 = vector.load %arg2[%c0_2, %c0_3, %c0_4] : memref<1x56x32xf32, #tpu.memory_space<vmem>>, vector<1x56x32xf32>
    %3 = vector.shape_cast %2 : vector<1x56x32xf32> to vector<56x32xf32>
    %4 = arith.truncf %1 : vector<8x32xf32> to vector<8x32xbf16>
    %5 = arith.truncf %3 : vector<56x32xf32> to vector<56x32xbf16>
    %c0_5 = arith.constant 0 : index
    %c0_6 = arith.constant 0 : index
    %6 = vector.load %arg7[%c0_5, %c0_6] : memref<32x256xbf16, #tpu.memory_space<vmem>>, vector<32x256xbf16>
    %cst = arith.constant dense<0.000000e+00> : vector<8x256xf32>
    %7 = tpu.matmul %4, %6, %cst {dimension_numbers = #tpu.dot_dimension_numbers<[1], [0], [0], [1], [0, 0, 1, 1], [], []>} : vector<8x32xbf16>, vector<32x256xbf16>, vector<8x256xf32> -> vector<8x256xf32>
    %8 = vector.extract_strided_slice %7 {offsets = [0, 0], sizes = [8, 128], strides = [1, 1]} : vector<8x256xf32> to vector<8x128xf32>
    %9 = arith.truncf %8 : vector<8x128xf32> to vector<8x128xbf16>
    %10 = vector.extract_strided_slice %7 {offsets = [0, 128], sizes = [8, 128], strides = [1, 1]} : vector<8x256xf32> to vector<8x128xf32>
    %11 = arith.truncf %10 : vector<8x128xf32> to vector<8x128xbf16>
    %c0_7 = arith.constant 0 : index
    %c0_8 = arith.constant 0 : index
    %12 = vector.load %arg8[%c0_7, %c0_8] : memref<32x128xbf16, #tpu.memory_space<vmem>>, vector<32x128xbf16>
    %cst_9 = arith.constant dense<0.000000e+00> : vector<56x128xf32>
    %13 = tpu.matmul %5, %12, %cst_9 {dimension_numbers = #tpu.dot_dimension_numbers<[1], [0], [0], [1], [0, 0, 1, 1], [], []>} : vector<56x32xbf16>, vector<32x128xbf16>, vector<56x128xf32> -> vector<56x128xf32>
    %c0_10 = arith.constant 0 : index
    %c0_11 = arith.constant 0 : index
    %14 = vector.load %arg3[%c0_10, %c0_11] : memref<56x8xbf16, #tpu.memory_space<vmem>>, vector<56x8xbf16>
    %cst_12 = arith.constant dense<0.000000e+00> : vector<56x128xf32>
    %15 = tpu.matmul %14, %9, %cst_12 {dimension_numbers = #tpu.dot_dimension_numbers<[1], [0], [0], [1], [0, 0, 1, 1], [], []>} : vector<56x8xbf16>, vector<8x128xbf16>, vector<56x128xf32> -> vector<56x128xf32>
    %c0_13 = arith.constant 0 : index
    %c0_14 = arith.constant 0 : index
    %16 = vector.load %arg4[%c0_13, %c0_14] : memref<56x8xbf16, #tpu.memory_space<vmem>>, vector<56x8xbf16>
    %cst_15 = arith.constant dense<0.000000e+00> : vector<56x128xf32>
    %17 = tpu.matmul %16, %11, %cst_15 {dimension_numbers = #tpu.dot_dimension_numbers<[1], [0], [0], [1], [0, 0, 1, 1], [], []>} : vector<56x8xbf16>, vector<8x128xbf16>, vector<56x128xf32> -> vector<56x128xf32>
    %18 = arith.addf %15, %17 : vector<56x128xf32>
    %19 = arith.addf %18, %13 : vector<56x128xf32>
    %c0_16 = arith.constant 0 : index
    %c0_17 = arith.constant 0 : index
    %20 = vector.load %arg9[%c0_16, %c0_17] : memref<1x128xf32, #tpu.memory_space<vmem>>, vector<1x128xf32>
    %21 = vector.broadcast %20 : vector<1x128xf32> to vector<56x128xf32>
    %22 = arith.addf %19, %21 : vector<56x128xf32>
    %23 = arith.negf %22 : vector<56x128xf32>
    %24 = math.exp %23 : vector<56x128xf32>
    %cst_18 = arith.constant 1.000000e+00 : f32
    %25 = vector.broadcast %cst_18 : f32 to vector<56x128xf32>
    %26 = arith.addf %25, %24 : vector<56x128xf32>
    %27 = arith.divf %25, %26 : vector<56x128xf32>
    %28 = arith.mulf %22, %27 : vector<56x128xf32>
    %29 = arith.truncf %28 : vector<56x128xf32> to vector<56x128xbf16>
    %c0_19 = arith.constant 0 : index
    %c0_20 = arith.constant 0 : index
    %30 = vector.load %arg10[%c0_19, %c0_20] : memref<128x128xbf16, #tpu.memory_space<vmem>>, vector<128x128xbf16>
    %cst_21 = arith.constant dense<0.000000e+00> : vector<56x128xf32>
    %31 = tpu.matmul %29, %30, %cst_21 {dimension_numbers = #tpu.dot_dimension_numbers<[1], [0], [0], [1], [0, 0, 1, 1], [], []>} : vector<56x128xbf16>, vector<128x128xbf16>, vector<56x128xf32> -> vector<56x128xf32>
    %c0_22 = arith.constant 0 : index
    %c0_23 = arith.constant 0 : index
    %32 = vector.load %arg11[%c0_22, %c0_23] : memref<1x128xf32, #tpu.memory_space<vmem>>, vector<1x128xf32>
    %33 = vector.broadcast %32 : vector<1x128xf32> to vector<56x128xf32>
    %34 = arith.addf %31, %33 : vector<56x128xf32>
    %35 = arith.negf %34 : vector<56x128xf32>
    %36 = math.exp %35 : vector<56x128xf32>
    %cst_24 = arith.constant 1.000000e+00 : f32
    %37 = vector.broadcast %cst_24 : f32 to vector<56x128xf32>
    %38 = arith.addf %37, %36 : vector<56x128xf32>
    %39 = arith.divf %37, %38 : vector<56x128xf32>
    %40 = arith.mulf %34, %39 : vector<56x128xf32>
    %c0_25 = arith.constant 0 : index
    %c0_26 = arith.constant 0 : index
    %41 = vector.load %arg5[%c0_25, %c0_26] : memref<8x56xbf16, #tpu.memory_space<vmem>>, vector<8x56xbf16>
    %42 = arith.truncf %40 : vector<56x128xf32> to vector<56x128xbf16>
    %cst_27 = arith.constant dense<0.000000e+00> : vector<8x128xf32>
    %43 = tpu.matmul %41, %42, %cst_27 {dimension_numbers = #tpu.dot_dimension_numbers<[1], [0], [0], [1], [0, 0, 1, 1], [], []>} : vector<8x56xbf16>, vector<56x128xbf16>, vector<8x128xf32> -> vector<8x128xf32>
    %c0_28 = arith.constant 0 : index
    %c0_29 = arith.constant 0 : index
    %44 = vector.load %arg6[%c0_28, %c0_29] : memref<8x1xf32, #tpu.memory_space<vmem>>, vector<8x1xf32>
    %45 = vector.broadcast %44 : vector<8x1xf32> to vector<8x128xf32>
    %46 = arith.mulf %43, %45 : vector<8x128xf32>
    %cst_30 = arith.constant 0.000000e+00 : f32
    %47 = vector.broadcast %cst_30 : f32 to vector<8x96xf32>
    %48 = tpu.concatenate %1, %47 in 1 : vector<8x32xf32>, vector<8x96xf32> -> vector<8x128xf32>
    %49 = arith.addf %48, %46 : vector<8x128xf32>
    %50 = arith.truncf %49 : vector<8x128xf32> to vector<8x128xbf16>
    %c0_31 = arith.constant 0 : index
    %c0_32 = arith.constant 0 : index
    %51 = vector.load %arg12[%c0_31, %c0_32] : memref<128x128xbf16, #tpu.memory_space<vmem>>, vector<128x128xbf16>
    %cst_33 = arith.constant dense<0.000000e+00> : vector<8x128xf32>
    %52 = tpu.matmul %50, %51, %cst_33 {dimension_numbers = #tpu.dot_dimension_numbers<[1], [0], [0], [1], [0, 0, 1, 1], [], []>} : vector<8x128xbf16>, vector<128x128xbf16>, vector<8x128xf32> -> vector<8x128xf32>
    %c0_34 = arith.constant 0 : index
    %c0_35 = arith.constant 0 : index
    %53 = vector.load %arg13[%c0_34, %c0_35] : memref<1x128xf32, #tpu.memory_space<vmem>>, vector<1x128xf32>
    %54 = vector.broadcast %53 : vector<1x128xf32> to vector<8x128xf32>
    %55 = arith.addf %52, %54 : vector<8x128xf32>
    %56 = arith.negf %55 : vector<8x128xf32>
    %57 = math.exp %56 : vector<8x128xf32>
    %cst_36 = arith.constant 1.000000e+00 : f32
    %58 = vector.broadcast %cst_36 : f32 to vector<8x128xf32>
    %59 = arith.addf %58, %57 : vector<8x128xf32>
    %60 = arith.divf %58, %59 : vector<8x128xf32>
    %61 = arith.mulf %55, %60 : vector<8x128xf32>
    %62 = arith.truncf %61 : vector<8x128xf32> to vector<8x128xbf16>
    %c0_37 = arith.constant 0 : index
    %c0_38 = arith.constant 0 : index
    %63 = vector.load %arg14[%c0_37, %c0_38] : memref<128x128xbf16, #tpu.memory_space<vmem>>, vector<128x128xbf16>
    %cst_39 = arith.constant dense<0.000000e+00> : vector<8x128xf32>
    %64 = tpu.matmul %62, %63, %cst_39 {dimension_numbers = #tpu.dot_dimension_numbers<[1], [0], [0], [1], [0, 0, 1, 1], [], []>} : vector<8x128xbf16>, vector<128x128xbf16>, vector<8x128xf32> -> vector<8x128xf32>
    %c0_40 = arith.constant 0 : index
    %c0_41 = arith.constant 0 : index
    %65 = vector.load %arg15[%c0_40, %c0_41] : memref<1x128xf32, #tpu.memory_space<vmem>>, vector<1x128xf32>
    %66 = vector.broadcast %65 : vector<1x128xf32> to vector<8x128xf32>
    %67 = arith.addf %64, %66 : vector<8x128xf32>
    %68 = arith.addf %49, %67 : vector<8x128xf32>
    %c0_42 = arith.constant 0 : index
    %c0_43 = arith.constant 0 : index
    %c0_44 = arith.constant 0 : index
    %69 = vector.load %arg16[%c0_42, %c0_43, %c0_44] : memref<1x8x128xf32, #tpu.memory_space<vmem>>, vector<1x8x128xf32>
    %70 = vector.shape_cast %69 : vector<1x8x128xf32> to vector<8x128xf32>
    %71 = vector.shape_cast %68 : vector<8x128xf32> to vector<1x8x128xf32>
    tpu.vector_store %arg16[%c0_42, %c0_43, %c0_44], %71 {strides = array<i32>} : memref<1x8x128xf32, #tpu.memory_space<vmem>>, vector<1x8x128xf32>,
    %c0_45 = arith.constant 0 : index
    %c0_46 = arith.constant 0 : index
    %c0_47 = arith.constant 0 : index
    %72 = vector.load %arg17[%c0_45, %c0_46, %c0_47] : memref<1x56x128xf32, #tpu.memory_space<vmem>>, vector<1x56x128xf32>
    %73 = vector.shape_cast %72 : vector<1x56x128xf32> to vector<56x128xf32>
    %74 = vector.shape_cast %40 : vector<56x128xf32> to vector<1x56x128xf32>
    tpu.vector_store %arg17[%c0_45, %c0_46, %c0_47], %74 {strides = array<i32>} : memref<1x56x128xf32, #tpu.memory_space<vmem>>, vector<1x56x128xf32>,
    return
  }
  func.func @transform_0(%arg0: i32) -> (i32, i32, i32) {
    %c0_i32 = arith.constant 0 : i32
    %c0_i32_0 = arith.constant 0 : i32
    %c0_i32_1 = arith.constant 0 : i32
    return %arg0, %c0_i32, %c0_i32_0 : i32, i32, i32
  }
  func.func @transform_1(%arg0: i32) -> (i32, i32, i32) {
    %c0_i32 = arith.constant 0 : i32
    %c0_i32_0 = arith.constant 0 : i32
    %c0_i32_1 = arith.constant 0 : i32
    return %arg0, %c0_i32, %c0_i32_0 : i32, i32, i32
  }
  func.func @transform_2(%arg0: i32) -> (i32, i32) {
    %c0_i32 = arith.constant 0 : i32
    %c0_i32_0 = arith.constant 0 : i32
    %c0_i32_1 = arith.constant 0 : i32
    return %c0_i32, %c0_i32_0 : i32, i32
  }
  func.func @transform_3(%arg0: i32) -> (i32, i32) {
    %c0_i32 = arith.constant 0 : i32
    %c0_i32_0 = arith.constant 0 : i32
    %c0_i32_1 = arith.constant 0 : i32
    return %c0_i32, %c0_i32_0 : i32, i32
  }
  func.func @transform_4(%arg0: i32) -> (i32, i32) {
    %c0_i32 = arith.constant 0 : i32
    %c0_i32_0 = arith.constant 0 : i32
    %c0_i32_1 = arith.constant 0 : i32
    return %c0_i32, %c0_i32_0 : i32, i32
  }
  func.func @transform_5(%arg0: i32) -> (i32, i32) {
    %c0_i32 = arith.constant 0 : i32
    %c0_i32_0 = arith.constant 0 : i32
    %c0_i32_1 = arith.constant 0 : i32
    return %c0_i32, %c0_i32_0 : i32, i32
  }
  func.func @transform_6(%arg0: i32) -> (i32, i32) {
    %c0_i32 = arith.constant 0 : i32
    %c0_i32_0 = arith.constant 0 : i32
    %c0_i32_1 = arith.constant 0 : i32
    return %c0_i32, %c0_i32_0 : i32, i32
  }
  func.func @transform_7(%arg0: i32) -> (i32, i32) {
    %c0_i32 = arith.constant 0 : i32
    %c0_i32_0 = arith.constant 0 : i32
    %c0_i32_1 = arith.constant 0 : i32
    return %c0_i32, %c0_i32_0 : i32, i32
  }
  func.func @transform_8(%arg0: i32) -> (i32, i32) {
    %c0_i32 = arith.constant 0 : i32
    %c0_i32_0 = arith.constant 0 : i32
    %c0_i32_1 = arith.constant 0 : i32
    return %c0_i32, %c0_i32_0 : i32, i32
  }
  func.func @transform_9(%arg0: i32) -> (i32, i32) {
    %c0_i32 = arith.constant 0 : i32
    %c0_i32_0 = arith.constant 0 : i32
    %c0_i32_1 = arith.constant 0 : i32
    return %c0_i32, %c0_i32_0 : i32, i32
  }
  func.func @transform_10(%arg0: i32) -> (i32, i32) {
    %c0_i32 = arith.constant 0 : i32
    %c0_i32_0 = arith.constant 0 : i32
    %c0_i32_1 = arith.constant 0 : i32
    return %c0_i32, %c0_i32_0 : i32, i32
  }
  func.func @transform_11(%arg0: i32) -> (i32, i32) {
    %c0_i32 = arith.constant 0 : i32
    %c0_i32_0 = arith.constant 0 : i32
    %c0_i32_1 = arith.constant 0 : i32
    return %c0_i32, %c0_i32_0 : i32, i32
  }
  func.func @transform_12(%arg0: i32) -> (i32, i32) {
    %c0_i32 = arith.constant 0 : i32
    %c0_i32_0 = arith.constant 0 : i32
    %c0_i32_1 = arith.constant 0 : i32
    return %c0_i32, %c0_i32_0 : i32, i32
  }
  func.func @transform_13(%arg0: i32) -> (i32, i32) {
    %c0_i32 = arith.constant 0 : i32
    %c0_i32_0 = arith.constant 0 : i32
    %c0_i32_1 = arith.constant 0 : i32
    return %c0_i32, %c0_i32_0 : i32, i32
  }
  func.func @transform_14(%arg0: i32) -> (i32, i32) {
    %c0_i32 = arith.constant 0 : i32
    %c0_i32_0 = arith.constant 0 : i32
    %c0_i32_1 = arith.constant 0 : i32
    return %c0_i32, %c0_i32_0 : i32, i32
  }
  func.func @transform_15(%arg0: i32) -> (i32, i32, i32) {
    %c0_i32 = arith.constant 0 : i32
    %c0_i32_0 = arith.constant 0 : i32
    %c0_i32_1 = arith.constant 0 : i32
    return %arg0, %c0_i32, %c0_i32_0 : i32, i32, i32
  }
  func.func @transform_16(%arg0: i32) -> (i32, i32, i32) {
    %c0_i32 = arith.constant 0 : i32
    %c0_i32_0 = arith.constant 0 : i32
    %c0_i32_1 = arith.constant 0 : i32
    return %arg0, %c0_i32, %c0_i32_0 : i32, i32, i32
  }
}

</mosaic_0001>

<bundles_post_ra>
// kernel: apply.1
= control target key start
LH: loop header
LB: loop body
LE: loop exit
PB: predicated region body
PF: predicated region fallthrough
CT: control target
= control target key end

     0   :  { %s3138_s0 = inlined_call_operand.hbm [shape: f32[2,8,32], index: 0, kind: input, shape index: {}]   ;;  %s3139_s1 = inlined_call_operand.vmem [shape: f32[2,56,32], index: 1, kind: input, shape index: {}]   ;;  %s3140_s2 = inlined_call_operand.hbm [shape: bf16[56,8], index: 2, kind: input, shape index: {}]   ;;  %s3141_s3 = inlined_call_operand.hbm [shape: bf16[56,8], index: 3, kind: input, shape index: {}]   ;;  %s3142_s4 = inlined_call_operand.hbm [shape: bf16[8,56], index: 4, kind: input, shape index: {}]   ;;  %s3143_s5 = inlined_call_operand.vmem [shape: f32[8,1], index: 5, kind: input, shape index: {}]   ;;  %s3144_s6 = inlined_call_operand.vmem [shape: bf16[32,256], index: 6, kind: input, shape index: {}]   ;;  %s3145_s7 = inlined_call_operand.vmem [shape: bf16[32,128], index: 7, kind: input, shape index: {}]   ;;  %s3146_s8 = inlined_call_operand.hbm [shape: f32[1,128], index: 8, kind: input, shape index: {}]   ;;  %s3147_s9 = inlined_call_operand.vmem [shape: bf16[128,128], index: 9, kind: input, shape index: {}]   ;;  %s3148_s10 = inlined_call_operand.hbm [shape: f32[1,128], index: 10, kind: input, shape index: {}]   ;;  %s3149_s11 = inlined_call_operand.vmem [shape: bf16[128,128], index: 11, kind: input, shape index: {}]   ;;  %s3150_s12 = inlined_call_operand.hbm [shape: f32[1,128], index: 12, kind: input, shape index: {}]   ;;  %s3151_s13 = inlined_call_operand.vmem [shape: bf16[128,128], index: 13, kind: input, shape index: {}]   ;;  %s3152_s14 = inlined_call_operand.vmem [shape: f32[1,128], index: 14, kind: input, shape index: {}]   ;;  %s3153_s15 = inlined_call_operand.hbm [shape: f32[2,8,128], index: 15, kind: output, shape index: {0}]   ;;  %s3154_s16 = inlined_call_operand.vmem [shape: f32[2,56,128], index: 16, kind: output, shape index: {1}]  }
   0x1   :  { %3165 = sst [smem:[#allocation20_spill]] %s3138_s0 }
   0x2   :  { %3166 = sst [smem:[#allocation21_spill]] %s3140_s2 }
   0x3   :  { %3167 = sst [smem:[#allocation22_spill]] %s3141_s3 }
   0x4   :  { %3168 = sst [smem:[#allocation23_spill]] %s3142_s4 }
   0x5   :  { %3169 = sst [smem:[#allocation24_spill]] %s3143_s5 }
   0x6   :  { %3170 = sst [smem:[#allocation25_spill]] %s3147_s9 }
   0x7   :  { %3171 = sst [smem:[#allocation26_spill]] %s3149_s11 }
   0x8   :  { %3172 = sst [smem:[#allocation27_spill]] %s3151_s13 }
   0x9   :  { %3173 = sst [smem:[#allocation28_spill]] %s3152_s14 }
   0xa   :  { %3174 = sst [smem:[#allocation29_spill]] %s3153_s15 }
   0xb   :  { %3175 = sst [smem:[#allocation30_spill]] %s3154_s16 }
   0xc   :  { %22 = vsyncpa [#allocation3], 0 }
   0xd   :  { %24 = vsyncpa [#allocation3 + $0x1], 0 }
   0xe   :  { %25 = vsyncpa [#allocation6], 0 }
   0xf   :  { %26 = vsyncpa [#allocation9], 0 }
  0x10   :  { %27 = vsyncpa [#allocation12], 0 }
  0x11   :  { %28 = vsyncpa [#allocation4], 0 }
  0x12   :  { %30 = vsyncpa [#allocation4 + $0x1], 0  ;;  %s2637_s21 = smov 0   ;;  %s2639_s22 = smov 0  }
  0x13   :  { %s2641_s23 = smov 0   ;;  %s2643_s24 = smov 0  }
  0x14 LB: > { %s2539_s25 = smov [#allocation5]   ;;  %s2658_s27 = sadd.s32 4294967295, %s2537_s24   ;;  %s2537_s24 = sphi %s2643_s24, %s3211_s24   ;;  %s2533_s23 = sphi %s2641_s23, %s3210_s23   ;;  %s2529_s22 = sphi %s2639_s22, %s3209_s22   ;;  %s2525_s21 = sphi %s2637_s21, %s3208_s21  }
  0x15   : > { %s430_s26 = sshll.u32 %s2539_s25, 4  ;;  %p1782_p0 = scmp.ge.s32.totalorder %s2537_s24, 1  ;;  %s2663_s26 = int_to_ptr.vmem [resolvable:$true] %s430_s26 }
  0x16   : > { %p3161_p1 = scmp.eq.s32.totalorder %s2658_s27, 0  ;;  %p418_p2 = scmp.lt.s32.totalorder %s2537_s24, 3 }
  0x17   : > { %s2540_s29 = smov [#allocation8]   ;;  %s2541_s17 = smov [#allocation11]  }
  0x18   : > { %p2665_p3 = pnand %p1782_p0, %p418_p2  ;;  %s457_s30 = sshll.u32 %s2540_s29, 4  ;;  %s2678_s30 = int_to_ptr.vmem [resolvable:$true] %s457_s30 }
  0x19   : > { %s491_s18 = sshll.u32 %s2541_s17, 4  ;;  %s3178_s2 = sld [smem:[#allocation21_spill]]  ;;  %s2680_s18 = int_to_ptr.vmem [resolvable:$true] %s491_s18 }
  0x1a   : > { %s3176_s28 = scalar_select %p2665_p3, 1, 0 }
  0x1b   : > { %p2076_p5 = pneg %p2665_p3 }
  0x1d   : > { %p2674_p6 = pnand %p2076_p5, %p3161_p1 }
  0x1f   : > { %s2261_s25 = scalar_lea.hbm %s3178_s2, 448  ;;  %p2690_p8 = pneg %p2674_p6 }
  0x20   : > { %p2262_p7 = scmp.ne.s32.totalorder %s3178_s2, %s2261_s25  ;;  %p2268_p11 = scmp.lt.u32.totalorder %s2261_s25, %s3178_s2 }
  0x22   : > { %p2264_p9 = pnand %p2690_p8, %p2262_p7 }
  0x24   : > { %p2265_p10 = pneg %p2264_p9 }
  0x26   : > { %p2270_p12 = pnand %p2268_p11, %p2265_p10 }
  0x28   : > { %2273 = shalt.err (!%p2270_p12)
}
  0x29   : > { %s2274_s14 = scalar_lea.vmem %s2663_s26, 448  ;;  %p2282_p5 = scmp.lt.s32.totalorder %s2663_s26, %s2663_s26 }
  0x2a   : > { %p2275_p13 = scmp.ne.s32.totalorder %s2663_s26, %s2274_s14  ;;  %p2283_p4 = scmp.lt.s32.totalorder %s2274_s14, %s2274_s14 }
  0x2c   : > { %p2277_p0 = pnand %p2275_p13, %p2690_p8  ;;  %p2284_p7 = por %p2283_p4, %p2282_p5 }
  0x2e   : > { %p2278_p2 = pneg %p2277_p0 }
  0x30   : > { %p2285_p9 = pnand %p2284_p7, %p2278_p2 }
  0x32   : > { %2288 = shalt.err (!%p2285_p9)
}
  0x33   : > { %s3160_s15 = smov 64   ;;  %s2543_s13 = smov 4  }
  0x34   : > { %2079 = dma.hbm_to_vmem [thread:$0]  (!%p2674_p6), %s3178_s2, 448, %s2663_s26, [#allocation6], %s3160_s15, %s3160_s15, %s2543_s13  }
  0x35   : > { %s3180_s4 = sld [smem:[#allocation23_spill]] }
  0x3b   : > { %s2289_s14 = scalar_lea.hbm %s3180_s4, 64 }
  0x3c   : > { %p2290_p4 = scmp.ne.s32.totalorder %s3180_s4, %s2289_s14  ;;  %p2296_p12 = scmp.lt.u32.totalorder %s2289_s14, %s3180_s4 }
  0x3e   : > { %p2292_p10 = pnand %p2290_p4, %p2690_p8 }
  0x40   : > { %p2293_p11 = pneg %p2292_p10 }
  0x42   : > { %p2298_p13 = pnand %p2296_p12, %p2293_p11 }
  0x44   : > { %2301 = shalt.err (!%p2298_p13)
}
  0x45   : > { %s2302_s26 = scalar_lea.vmem %s2678_s30, 64  ;;  %p2310_p7 = scmp.lt.s32.totalorder %s2678_s30, %s2678_s30 }
  0x46   : > { %p2303_p0 = scmp.ne.s32.totalorder %s2678_s30, %s2302_s26  ;;  %p2311_p9 = scmp.lt.s32.totalorder %s2302_s26, %s2302_s26 }
  0x48   : > { %p2305_p2 = pnand %p2303_p0, %p2690_p8  ;;  %p2312_p4 = por %p2311_p9, %p2310_p7 }
  0x4a   : > { %p2306_p5 = pneg %p2305_p2 }
  0x4c   : > { %p2313_p10 = pnand %p2312_p4, %p2306_p5 }
  0x4e   : > { %2316 = shalt.err (!%p2313_p10)
}
  0x4f   : > { %2085 = dma.hbm_to_vmem [thread:$0]  (!%p2674_p6), %s3180_s4, 64, %s2678_s30, [#allocation9]  }
  0x50   : > { %s2317_s19 = scalar_lea.hbm %s3148_s10, 16 }
  0x51   : > { %p2318_p11 = scmp.ne.s32.totalorder %s3148_s10, %s2317_s19  ;;  %p2324_p0 = scmp.lt.u32.totalorder %s2317_s19, %s3148_s10 }
  0x53   : > { %p2320_p12 = pnand %p2318_p11, %p2690_p8 }
  0x55   : > { %p2321_p13 = pneg %p2320_p12 }
  0x57   : > { %p2326_p2 = pnand %p2324_p0, %p2321_p13 }
  0x59   : > { %2329 = shalt.err (!%p2326_p2)
}
  0x5a   : > { %s2330_s30 = scalar_lea.vmem %s2680_s18, 16  ;;  %s2337_s26 = scalar_lea.vmem %s2680_s18, 32 }
  0x5b   : > { %p2331_p5 = scmp.ne.s32.totalorder %s2680_s18, %s2330_s30  ;;  %p2338_p4 = scmp.lt.s32.totalorder %s2680_s18, %s2680_s18 }
  0x5c   : > { %p2339_p10 = scmp.lt.s32.totalorder %s2337_s26, %s2330_s30 }
  0x5d   : > { %p2333_p7 = pnand %p2331_p5, %p2690_p8 }
  0x5e   : > { %p2340_p11 = por %p2339_p10, %p2338_p4 }
  0x5f   : > { %p2334_p9 = pneg %p2333_p7 }
  0x61   : > { %p2341_p12 = pnand %p2340_p11, %p2334_p9 }
  0x63   : > { %2344 = shalt.err (!%p2341_p12)
}
  0x64   : > { %2091 = dma.hbm_to_vmem [thread:$0]  (!%p2674_p6), %s3148_s10, 16, %s2680_s18, [#allocation12]  }
  0x65   : > { %s2544_s11 = smov [#allocation7]   ;;  %s2545_s19 = smov [#allocation10]  }
  0x66   : > { %s443_s16 = sshll.u32 %s2544_s11, 4  ;;  %s477_s20 = sshll.u32 %s2545_s19, 4  ;;  %s444_s16 = int_to_ptr.vmem [resolvable:$true] %s443_s16  ;;  %s478_s20 = int_to_ptr.vmem [resolvable:$true] %s477_s20 }
  0x67   : > { %s3181_s3 = sld [smem:[#allocation22_spill]] }
  0x6d   : > { %s2345_s14 = scalar_lea.hbm %s3181_s3, 448 }
  0x6e   : > { %p2346_p13 = scmp.ne.s32.totalorder %s3181_s3, %s2345_s14  ;;  %p2352_p5 = scmp.lt.u32.totalorder %s2345_s14, %s3181_s3 }
  0x70   : > { %p2348_p0 = pnand %p2346_p13, %p2690_p8 }
  0x72   : > { %p2349_p2 = pneg %p2348_p0 }
  0x74   : > { %p2354_p7 = pnand %p2352_p5, %p2349_p2 }
  0x76   : > { %2357 = shalt.err (!%p2354_p7)
}
  0x77   : > { %s2358_s18 = scalar_lea.vmem %s444_s16, 448  ;;  %p2366_p11 = scmp.lt.s32.totalorder %s444_s16, %s444_s16 }
  0x78   : > { %p2359_p9 = scmp.ne.s32.totalorder %s444_s16, %s2358_s18  ;;  %p2367_p12 = scmp.lt.s32.totalorder %s2358_s18, %s2358_s18 }
  0x7a   : > { %p2361_p4 = pnand %p2359_p9, %p2690_p8  ;;  %p2368_p1 = por %p2367_p12, %p2366_p11 }
  0x7c   : > { %p2362_p10 = pneg %p2361_p4 }
  0x7e   : > { %p2369_p3 = pnand %p2368_p1, %p2362_p10 }
  0x80   : > { %2372 = shalt.err (!%p2369_p3)
}
  0x81   : > { %s3182_s9 = smov 64   ;;  %s2373_s17 = scalar_lea.hbm %s3146_s8, 16 }
  0x82   : > { %2082 = dma.hbm_to_vmem [thread:$0]  (!%p2674_p6), %s3181_s3, 448, %s444_s16, [#allocation6], %s3182_s9, %s3182_s9, %s2543_s13  }
  0x83   : > { %p2374_p1 = scmp.ne.s32.totalorder %s3146_s8, %s2373_s17  ;;  %p2380_p0 = scmp.lt.u32.totalorder %s2373_s17, %s3146_s8 }
  0x85   : > { %p2376_p3 = pnand %p2374_p1, %p2690_p8 }
  0x87   : > { %p2377_p13 = pneg %p2376_p3 }
  0x89   : > { %p2382_p2 = pnand %p2380_p0, %p2377_p13 }
  0x8b   : > { %2385 = shalt.err (!%p2382_p2)
}
  0x8c   : > { %s2386_s18 = scalar_lea.vmem %s478_s20, 16  ;;  %s2393_s13 = scalar_lea.vmem %s478_s20, 32 }
  0x8d   : > { %p2387_p5 = scmp.ne.s32.totalorder %s478_s20, %s2386_s18  ;;  %p2394_p4 = scmp.lt.s32.totalorder %s478_s20, %s478_s20 }
  0x8e   : > { %p2395_p10 = scmp.lt.s32.totalorder %s2393_s13, %s2386_s18 }
  0x8f   : > { %p2389_p7 = pnand %p2387_p5, %p2690_p8 }
  0x90   : > { %p2396_p11 = por %p2395_p10, %p2394_p4 }
  0x91   : > { %p2390_p9 = pneg %p2389_p7 }
  0x93   : > { %p2397_p12 = pnand %p2396_p11, %p2390_p9 }
  0x95   : > { %2400 = shalt.err (!%p2397_p12)
}
  0x96   : > { %2088 = dma.hbm_to_vmem [thread:$0]  (!%p2674_p6), %s3146_s8, 16, %s478_s20, [#allocation9]  }
  0x97   : > { %s2546_s15 = smov [#allocation13]   ;;  %s2401_s17 = scalar_lea.hbm %s3150_s12, 16 }
  0x98   : > { %s505_s11 = sshll.u32 %s2546_s15, 4  ;;  %p2402_p1 = scmp.ne.s32.totalorder %s3150_s12, %s2401_s17  ;;  %s506_s11 = int_to_ptr.vmem [resolvable:$true] %s505_s11 }
  0x99   : > { %p2408_p0 = scmp.lt.u32.totalorder %s2401_s17, %s3150_s12 }
  0x9a   : > { %p2404_p3 = pnand %p2402_p1, %p2690_p8 }
  0x9c   : > { %p2405_p13 = pneg %p2404_p3 }
  0x9e   : > { %p2410_p2 = pnand %p2408_p0, %p2405_p13 }
  0xa0   : > { %2413 = shalt.err (!%p2410_p2)
}
  0xa1   : > { %s2414_s20 = scalar_lea.vmem %s506_s11, 16  ;;  %s2421_s18 = scalar_lea.vmem %s506_s11, 32 }
  0xa2   : > { %p2415_p5 = scmp.ne.s32.totalorder %s506_s11, %s2414_s20  ;;  %p2422_p4 = scmp.lt.s32.totalorder %s506_s11, %s506_s11 }
  0xa3   : > { %p2423_p10 = scmp.lt.s32.totalorder %s2421_s18, %s2414_s20 }
  0xa4   : > { %p2417_p7 = pnand %p2415_p5, %p2690_p8 }
  0xa5   : > { %p2424_p11 = por %p2423_p10, %p2422_p4 }
  0xa6   : > { %p2418_p9 = pneg %p2417_p7 }
  0xa8   : > { %p2425_p12 = pnand %p2424_p11, %p2418_p9 }
  0xaa   : > { %2428 = shalt.err (!%p2425_p12)
}
  0xab   : > { %2094 = dma.hbm_to_vmem [thread:$0]  (!%p2674_p6), %s3150_s12, 16, %s506_s11, [#allocation12]  }
  0xac   : > { %s1781_s29 = sadd.s32 4294967294, %s2537_s24   ;;  %s2820_s0 = sadd.s32 1, %s2537_s24  }
  0xad   : > { %s40_s9 = ssub.s32 %s2537_s24, %s2820_s0  ;;  %s43_s15 = sadd.s32 1, %s2533_s23 }
  0xae   : > { %p41_p8 = scmp.eq.s32.totalorder %s40_s9, 0  ;;  %p50_p1 = scmp.ne.s32.totalorder %s2533_s23, %s2529_s22 }
  0xaf   : > { %p51_p3 = scmp.eq.s32.totalorder %s2537_s24, 0  ;;  %p56_p13 = scmp.ne.s32.totalorder %s2529_s22, %s2525_s21 }
  0xb0   : > { %s2831_s19 = scalar_select %p41_p8, %s2533_s23, %s43_s15  }
  0xb1   : > { %p2833_p0 = por %p51_p3, %p50_p1  ;;  %p3184_p2 = scmp.eq.s32.totalorder %s2658_s27, 0 }
  0xb2   : > { %p379_p5 = scmp.eq.s32.totalorder %s2658_s27, 1  ;;  %p385_p7 = scmp.eq.s32.totalorder %s1781_s29, 1 }
  0xb3   : > { %p2839_p6 = por %p3184_p2, %p56_p13  ;;  %p2109_p9 = scmp.lt.s32.totalorder %s2537_s24, 2 }
  0xb4   : > { %s522_s17 = sand.u32 1, %s2533_s23   ;;  %p2846_p4 = por %p379_p5, %p50_p1 }
  0xb5   : > { %p2850_p10 = por %p385_p7, %p56_p13  ;;  %s1790_s26 = sshll.u32 %s522_s17, 3 }
  0xb6   : > { %s3186_s14 = scalar_select %p2846_p4, 1, 0 }
  0xb7   : > { %s3187_s30 = scalar_select %p2850_p10, 1, 0 }
  0xb8   : > { %s1791_s5 = sshll.u32 %s2537_s24, 7  ;;  %s3188_s13 = sld [smem:[#allocation20_spill]] }
  0xb9   : > { %s526_s29 = scalar_lea.vmem [#allocation2], %s1790_s26  ;;  %p2864_p11 = pnand %p2109_p9, %p2833_p0 }
  0xba   : > { %s533_s9 = sshll.u32 %s526_s29, 4  ;;  %s523_s2 = scalar_lea.sflag [#allocation3], %s522_s17  ;;  %s2860_s9 = int_to_ptr.vmem [resolvable:$true] %s533_s9 }
  0xbb   : > { %p2431_p8 = pneg %p2864_p11 }
  0xbe   : > { %s2858_s16 = scalar_lea.hbm %s3188_s13, %s1791_s5  ;;  %s2434_s20 = scalar_lea.hbm %s3188_s13, 256 }
  0xbf   : > { %s2429_s3 = scalar_lea.hbm %s2858_s16, 128  ;;  %p2435_p13 = scmp.lt.u32.totalorder %s2858_s16, %s3188_s13 }
  0xc0   : > { %p2430_p12 = scmp.ne.s32.totalorder %s2858_s16, %s2429_s3  ;;  %p2436_p0 = scmp.lt.u32.totalorder %s2434_s20, %s2429_s3 }
  0xc1   : > { %p2438_p5 = scmp.lt.u32.totalorder %s2429_s3, %s2858_s16 }
  0xc2   : > { %p2432_p1 = pnand %p2431_p8, %p2430_p12  ;;  %p2437_p2 = por %p2436_p0, %p2435_p13 }
  0xc4   : > { %p2433_p3 = pneg %p2432_p1  ;;  %p2439_p7 = por %p2438_p5, %p2437_p2 }
  0xc6   : > { %p2440_p9 = pnand %p2439_p7, %p2433_p3 }
  0xc8   : > { %2443 = shalt.err (!%p2440_p9)
}
  0xc9   : > { %s2444_s17 = scalar_lea.vmem %s2860_s9, 128  ;;  %s2547_s29 = smov [#allocation2]  }
  0xca   : > { %p2445_p12 = scmp.ne.s32.totalorder %s2860_s9, %s2444_s17  ;;  %s2449_s26 = sshll.u32 %s2547_s29, 4  ;;  %s2450_s26 = int_to_ptr.vmem [resolvable:$false] %s2449_s26 }
  0xcb   : > { %s2451_s5 = scalar_lea.vmem %s2450_s26, 256  ;;  %p2452_p4 = scmp.lt.s32.totalorder %s2860_s9, %s2450_s26 }
  0xcc   : > { %p2447_p1 = pnand %p2445_p12, %p2431_p8  ;;  %p2453_p13 = scmp.lt.s32.totalorder %s2451_s5, %s2444_s17 }
  0xce   : > { %p2448_p10 = pneg %p2447_p1  ;;  %p2454_p0 = por %p2453_p13, %p2452_p4 }
  0xd0   : > { %p2455_p2 = pnand %p2454_p0, %p2448_p10 }
  0xd2   : > { %2458 = shalt.err (!%p2455_p2)
}
  0xd3   : > { %2098 = dma.hbm_to_vmem [thread:$0]  (!%p2864_p11), %s2858_s16, 128, %s2860_s9, %s523_s2  }
  0xd4   : > { %p3190_p3 = scmp.ne.s32.totalorder %s3176_s28, 0 }
  0xd5   : > { %s2896_s3 = sand.u32 (!%p3190_p3), 1, %s2529_s22  }
  0xd6   : > { %550 = sbr.rel (%p3190_p3) target bundleno = 1686 (0x696), region = 80  ;;  %s3164_s20 = sshll.u32 (!%p3190_p3), %s2896_s3, 3 }
  0xd7   : > { %s553_s25 = scalar_lea.sflag (!%p3190_p3), [#allocation3], %s2896_s3  ;;  %s556_s18 = scalar_lea.vmem (!%p3190_p3), [#allocation2], %s3164_s20 }
  0xdd   : > { %2504 = dma.done.wait (%p2839_p6), %s553_s25, 128  }
  0xde   : > { %2506 = vsyncadd (%p2839_p6), %s553_s25, 4294967168  ;;  %p3191_p4 = scmp.eq.s32.totalorder %s2658_s27, 0 }
  0xe0   : > { %2508 = dma.done.wait (%p3191_p4), [#allocation6], 896   ;;  %p3192_p10 = pmov %p3191_p4 }
  0xe1   : > { %p3193_p11 = pmov %p3191_p4 }
  0xe2   : > { %2510 = vsyncadd (%p3192_p10), [#allocation6], 4294966400 }
  0xe3   : > { %2512 = dma.done.wait (%p3193_p11), [#allocation9], 80   ;;  %p3194_p8 = pmov %p3191_p4 }
  0xe4   : > { %p3195_p5 = pmov %p3191_p4 }
  0xe5   : > { %2514 = vsyncadd (%p3194_p8), [#allocation9], 4294967216 }
  0xe6   : > { %2516 = dma.done.wait (%p3195_p5), [#allocation12], 32   ;;  %p3196_p7 = pmov %p3191_p4 }
  0xe7   : > { %p639_p6 = scmp.lt.s32.totalorder %s2658_s27, 1  ;;  %v2548_v0 = vmov 0   ;;  %v2161_v1 = vld [vmem:[%s3144_s6 + $0x4] ss:$8 sps:$4 sm:$0xff]   ;;  %v2163_v2 = vld [vmem:[%s3144_s6] ss:$8 sps:$4 sm:$0xff]  }
  0xe8   : > { %2518 = vsyncadd (%p3196_p7), [#allocation12], 4294967264  ;;  %723 = vmatprep.mubr.bf16.mxu1 %v2548_v0  ;;  %2160 = vset.pattern.permute.xlu0 %v2548_v0  ;;  %v2164_v3 = vld [vmem:[%s3144_s6 + $0x14] ss:$8 sps:$4 sm:$0xff]   ;;  %v2166_v4 = vld [vmem:[%s3144_s6 + $0x10] ss:$8 sps:$4 sm:$0xff]  }
  0xe9   : > { %s2920_s2 = scalar_select %p639_p6, %s2658_s27, 1  ;;  %691 = vmatprep.subr.bf16.mxu1 %v2161_v1  ;;  %v2940_v5 = vld [vmem:[%s556_s18] sm:$0xff]  ;;  %vm687_vm0 = vcmask 261120   ;;  %vm858_vm1 = vcmask 64512   ;;  %vm871_vm2 = vcmask 1043456   ;;  %v2170_v28 = vld [vmem:[#allocation7 + $0x8] sm:$0xff]  }
  0xea   : > { %692 = vmatpush1.bf16.msra.mxu1 %v2163_v2  ;;  %v2167_v6 = vld [vmem:[%s3145_s7] sm:$0xff]   ;;  %v658_v9 = vpack.c.bf16 %v2940_v5, %v2940_v5  ;;  %v2168_v10 = vld [vmem:[%s3145_s7 + $0x8] sm:$0xff]   ;;  %v2173_v32 = vld [vmem:[#allocation5] sm:$0xff]   ;;  %s3197_s18 = sld [smem:[#allocation25_spill]]  ;;  %vm2550_vm3 = vmmov 0   ;;  %s3198_s11 = sld [smem:[#allocation24_spill]] }
  0xeb   : > { %s2047_s28 = smul.u32 56, %s2920_s2  ;;  %693 = vmatprep.subr.bf16.mxu1 %v2164_v3  ;;  %v2169_v20 = vld [vmem:[#allocation7] sm:$0xff]   ;;  %v2171_v29 = vld [vmem:[#allocation7 + $0x10] sm:$0xff]   ;;  %v2172_v31 = vld [vmem:[#allocation7 + $0x18] ss:$0 sps:$4 sm:$0xff]   ;;  %s3199_s15 = sld [smem:[#allocation26_spill]] }
  0xec   : > { %v2174_v33 = vld [vmem:[#allocation5 + $0x8] sm:$0xff]   ;;  %v2175_v34 = vld [vmem:[#allocation5 + $0x10] sm:$0xff]   ;;  %v2176_v35 = vld [vmem:[#allocation5 + $0x18] ss:$0 sps:$4 sm:$0xff]   ;;  %s3200_s17 = sld [smem:[#allocation30_spill]]  ;;  %vm1299_vm4 = vcmask 457728  }
  0xed   : > { %s643_s4 = scalar_lea.vmem %s3139_s1, %s2047_s28  ;;  %v1830_v52 = vld [vmem:[#allocation10] ss:$0 sm:$0xff]  ;;  %s3201_s16 = sld [smem:[#allocation27_spill]] }
  0xee   : > { %v651_v7 = vld [vmem:[%s643_s4] sm:$0xff]  ;;  %v652_v8 = vld [vmem:[%s643_s4 + $0x8] sm:$0xff]  ;;  %694 = vmatpush1.bf16.msra.mxu1 %v2166_v4  ;;  %v653_v12 = vld [vmem:[%s643_s4 + $0x10] sm:$0xff]  ;;  %s3202_s2 = sld [smem:[#allocation28_spill]]  ;;  %s3203_s26 = sshll.u32 %s2896_s3, 3 }
  0xef   : > { %v659_v11 = vpack.c.bf16 %v652_v8, %v651_v7  ;;  %1929 = vmatprep.subr.bf16.mxu1 %v2167_v6  ;;  %v654_v13 = vld [vmem:[%s643_s4 + $0x18] sm:$0xff]  ;;  %v655_v14 = vld [vmem:[%s643_s4 + $0x20] sm:$0xff]  ;;  %v656_v15 = vld [vmem:[%s643_s4 + $0x28] sm:$0xff]  ;;  %s631_s5 = scalar_lea.vmem [#allocation14], %s3203_s26  ;;  %p3205_p12 = scmp.ne.s32.totalorder %s3186_s14, 0 }
  0xf0   : > { %v660_v16 = vpack.c.bf16 %v654_v13, %v653_v12  ;;  %v661_v17 = vpack.c.bf16 %v656_v15, %v655_v14  ;;  %v657_v18 = vld [vmem:[%s643_s4 + $0x30] sm:$0xff]  ;;  %v2177_v40 = vld [vmem:[%s3197_s18] sm:$0xff]   ;;  %v2178_v41 = vld [vmem:[%s3197_s18 + $0x8] sm:$0xff]   ;;  %s1614_s25 = sshll.u32 %s631_s5, 4  ;;  %s3204_s4 = sld [smem:[#allocation29_spill]]  ;;  %s3096_s25 = int_to_ptr.vmem [resolvable:$true] %s1614_s25 }
  0xf1   : > { %1807 = vmatmul.mubr.msk.bf16.vlgmr.msra.gmra.mrb[0].mxu1 %vm687_vm0, %v658_v9  ;;  %v662_v19 = vpack.c.bf16 %v657_v18, %v657_v18  ;;  %1961 = vmatprep.subr.bf16.mxu0 %v2177_v40  ;;  %v2179_v42 = vld [vmem:[%s3197_s18 + $0x10] sm:$0xff]   ;;  %v2180_v43 = vld [vmem:[%s3197_s18 + $0x18] sm:$0xff]   ;;  %v2181_v44 = vld [vmem:[%s3197_s18 + $0x20] sm:$0xff]  }
  0xf2   : > { %1930 = vmatpush3.bf16.msra.mxu1 %v2167_v6  ;;  %1933 = vmatprep.mubr.msk.bf16.mxu1 %vm687_vm0, %v659_v11  ;;  %v2182_v45 = vld [vmem:[%s3197_s18 + $0x28] sm:$0xff]   ;;  %v2183_v46 = vld [vmem:[%s3197_s18 + $0x30] sm:$0xff]   ;;  %v2184_v47 = vld [vmem:[%s3197_s18 + $0x38] sm:$0xff]   ;;  %s3029_s29 = scalar_lea.vmem %s3200_s17, %s2047_s28  ;;  %s1875_s28 = sshll.u32 %s2658_s27, 7 }
  0xf3   : > { %1931 = vmatprep.subr.bf16.mxu1 %v2168_v10  ;;  %1962 = vmatpush3.bf16.msra.mxu0 %v2177_v40  ;;  %s1596_s27 = scalar_lea.sflag [#allocation4], %s2896_s3  ;;  %s2459_s17 = scalar_lea.vmem %s3096_s25, 128 }
  0xf4   : > { %1963 = vmatprep.subr.bf16.mxu0 %v2178_v41  ;;  %p2460_p9 = scmp.ne.s32.totalorder %s3096_s25, %s2459_s17 }
  0xf6   : > { %1932 = vmatpush3.bf16.msra.mxu1 %v2168_v10  ;;  %s3094_s20 = scalar_lea.hbm %s3204_s4, %s1875_s28  ;;  %p2461_p1 = pnand %p2460_p9, %p3205_p12 }
  0xf7   : > { %1964 = vmatpush3.bf16.msra.mxu0 %v2178_v41 }
  0xf8   : > { %1965 = vmatprep.subr.bf16.mxu0 %v2179_v42  ;;  %p2462_p13 = pneg %p2461_p1 }
  0xf9   : > { %1934 = vmatmul.mubr.msk.bf16.vlgmr.msra.gmra.mrb[4].mxu1 %vm687_vm0, %v660_v16 }
  0xfa   : > { %1937 = vmatprep.mubr.msk.bf16.mxu1 %vm687_vm0, %v661_v17 }
  0xfb   : > { %1966 = vmatpush3.bf16.msra.mxu0 %v2179_v42 }
  0xfc   : > { %1967 = vmatprep.subr.bf16.mxu0 %v2180_v43 }
  0xff   : > { %1968 = vmatpush3.bf16.msra.mxu0 %v2180_v43 }
 0x100   : > { %1969 = vmatprep.subr.bf16.mxu0 %v2181_v44 }
 0x101   : > { %1938 = vmatmul.mubr.msk.bf16.gmra.mrb[8].mxu1 %vm687_vm0, %v662_v19 }
 0x102   : > { %1943 = vmatprep.mubr.msk.bf16.mxu1 %vm858_vm1, %v2169_v20 }
 0x103   : > { %1970 = vmatpush3.bf16.msra.mxu0 %v2181_v44 }
 0x104   : > { %1971 = vmatprep.subr.bf16.mxu0 %v2182_v45 }
 0x107   : > { %1972 = vmatpush3.bf16.msra.mxu0 %v2182_v45 }
 0x108   : > { %1973 = vmatprep.subr.bf16.mxu0 %v2183_v46 }
 0x10b   : > { %1974 = vmatpush3.bf16.msra.mxu0 %v2183_v46 }
 0x10c   : > { %1975 = vmatprep.subr.bf16.mxu0 %v2184_v47 }
 0x10f   : > { %1976 = vmatpush3.bf16.msra.mxu0 %v2184_v47 }
 0x1c4   : > { %v725_v21 = vpop.f32.mrb[0].mxu1 }
 0x1c5   : > { %v727_v22 = vpop.f32.mrb[1].mxu1  ;;  %v732_v26 = vpack.c.bf16 %v725_v21, %v725_v21 }
 0x1c6   : > { %v733_v23 = vpack.c.bf16 %v727_v22, %v727_v22  ;;  %v729_v24 = vpop.f32.mrb[2].mxu1 }
 0x1c7   : > { %v730_v25 = vpop.f32.mrb[3].mxu1  ;;  %v970_v30 = vsel %vm871_vm2, %v732_v26, 0 }
 0x1c8   : > { %v873_v27 = vsel %vm871_vm2, %v733_v23, 0  ;;  %2045 = vmatprep.subr.msk.bf16.mxu1 %vm871_vm2, %v733_v23 }
 0x1c9   : > { %1942 = vmatpush3.bf16.msra.mxu1 %v873_v27 }
 0x1ca   : > { %2046 = vmatprep.subr.msk.bf16.mxu1 %vm871_vm2, %v732_v26 }
 0x1cc   : > { %1944 = vmatmul.mubr.msk.bf16.vlgmr.msra.gmra.mrb[4].mxu1 %vm858_vm1, %v2170_v28 }
 0x1cd   : > { %1952 = vmatpush3.bf16.msra.mxu1 %v970_v30  ;;  %1947 = vmatprep.mubr.msk.bf16.mxu1 %vm858_vm1, %v2171_v29 }
 0x1d4   : > { %1948 = vmatmul.mubr.msk.bf16.gmra.mrb[12].mxu1 %vm858_vm1, %v2172_v31  ;;  %v1939_v36 = vpop.f32.mrb[8].mxu1 }
 0x1d5   : > { %1953 = vmatprep.mubr.msk.bf16.mxu1 %vm858_vm1, %v2173_v32  ;;  %v812_v37 = vpop.f32.mrb[9].mxu1 }
 0x1d6   : > { %v1940_v38 = vpop.f32.mrb[10].mxu1 }
 0x1d7   : > { %v815_v39 = vpop.f32.mrb[11].mxu1 }
 0x1dc   : > { %1954 = vmatmul.mubr.msk.bf16.vlgmr.msra.gmra.mrb[4].mxu1 %vm858_vm1, %v2174_v33 }
 0x1dd   : > { %1957 = vmatprep.mubr.msk.bf16.mxu1 %vm858_vm1, %v2175_v34 }
 0x1e4   : > { %1958 = vmatmul.mubr.msk.bf16.gmra.mrb[16].mxu1 %vm858_vm1, %v2176_v35 }
 0x2a7   : > { %v1949_v48 = vpop.f32.mrb[12].mxu1 }
 0x2a8   : > { %v925_v49 = vpop.f32.mrb[13].mxu1 }
 0x2a9   : > { %v1950_v50 = vpop.f32.mrb[14].mxu1 }
 0x2aa   : > { %v928_v51 = vpop.f32.mrb[15].mxu1  ;;  %v2549_v50 = vmov 0.0  }
 0x2ab   : > { %1985 = vmatprep.subr.bf16.mxu0 %v2549_v50  ;;  %1997 = vmatprep.subr.bf16.mxu1 %v2549_v50 }
 0x2ac   : > { %2013 = vmatprep.mubr.msk.bf16.mxu1 %vm2550_vm3, %v2549_v50 }
 0x2af   : > { %v1955_v53 = vpop.f32.mrb[4].mxu1 }
 0x2b0   : > { %v1052_v54 = vadd.f32 %v1955_v53, %v1830_v52  ;;  %v1006_v55 = vpop.f32.mrb[5].mxu1  ;;  %v2186_v53 = vld [vmem:[%s3199_s15 + $0x8] sm:$0xff]  }
 0x2b1   : > { %v1050_v56 = vadd.f32 %v1830_v52, %v1006_v55  ;;  %v1956_v57 = vpop.f32.mrb[6].mxu1  ;;  %v2188_v55 = vld [vmem:[%s3199_s15 + $0x18] sm:$0xff]  }
 0x2b2   : > { %v1833_v58 = vmul.f32 -1.442695, %v1052_v54  ;;  %v1053_v59 = vadd.f32 %v1956_v57, %v1830_v52  ;;  %v1009_v60 = vpop.f32.mrb[7].mxu1  ;;  %v2190_v57 = vld [vmem:[%s3199_s15 + $0x28] sm:$0xff]  }
 0x2b3   : > { %v1831_v61 = vmul.f32 -1.442695, %v1050_v56  ;;  %v1051_v62 = vadd.f32 %v1830_v52, %v1009_v60 }
 0x2b4   : > { %2201 = vpow2.f32 %v1833_v58  ;;  %v1834_v63 = vmul.f32 -1.442695, %v1053_v59  ;;  %v1838_v58 = vld [vmem:[#allocation11] ss:$0 sm:$0xff] }
 0x2b5   : > { %2203 = vpow2.f32 %v1831_v61  ;;  %v1832_v0 = vmul.f32 -1.442695, %v1051_v62 }
 0x2b6   : > { %2205 = vpow2.f32 %v1834_v63 }
 0x2b7   : > { %2207 = vpow2.f32 %v1832_v0  ;;  %v1959_v1 = vpop.f32.mrb[16].mxu1 }
 0x2b8   : > { %v1031_v2 = vadd.f32 %v1959_v1, %v1949_v48  ;;  %v1022_v3 = vpop.f32.mrb[17].mxu1 }
 0x2b9   : > { %v1023_v4 = vadd.f32 %v1022_v3, %v925_v49  ;;  %v1960_v6 = vpop.f32.mrb[18].mxu1 }
 0x2ba   : > { %v1042_v7 = vadd.f32 %v1939_v36, %v1031_v2  ;;  %v1025_v8 = vpop.f32.mrb[19].mxu1 }
 0x2bb   : > { %v1040_v9 = vadd.f32 %v1023_v4, %v812_v37  ;;  %v1026_v10 = vadd.f32 %v1025_v8, %v928_v51  ;;  %v1346_v51 = vld [vmem:[%s3198_s11] sm:$0xff] }
 0x2bc   : > { %v1056_v11 = vadd.f32 %v1830_v52, %v1042_v7  ;;  %1349 = vperm.xlu0 %2160, %v1346_v51  }
 0x2bd   : > { %v1054_v12 = vadd.f32 %v1830_v52, %v1040_v9  ;;  %v1041_v13 = vadd.f32 %v1026_v10, %v815_v39 }
 0x2be   : > { %v2202_v14 = vpop.eup %2201  ;;  %v1837_v15 = vmul.f32 -1.442695, %v1056_v11 }
 0x2bf   : > { %v2204_v16 = vpop.eup %2203  ;;  %v1080_v17 = vadd.f32 1.0, %v2202_v14  ;;  %v1055_v18 = vadd.f32 %v1830_v52, %v1041_v13  ;;  %v1835_v23 = vmul.f32 -1.442695, %v1054_v12  ;;  %v2185_v52 = vld [vmem:[%s3199_s15] sm:$0xff]  }
 0x2c0   : > { %v2206_v19 = vpop.eup %2205  ;;  %v1078_v20 = vadd.f32 1.0, %v2204_v16  ;;  %2209 = vpow2.f32 %v1837_v15  ;;  %1998 = vmatpush3.bf16.msra.mxu1 %v2185_v52  ;;  %v1294_v52 = vld [vmem:[#allocation8] sm:$0xf] }
 0x2c1   : > { %v2208_v21 = vpop.eup %2207  ;;  %2211 = vrcp.f32 %v1080_v17  ;;  %v1081_v22 = vadd.f32 1.0, %v2206_v19  ;;  %v1836_v25 = vmul.f32 -1.442695, %v1055_v18  ;;  %1999 = vmatprep.subr.bf16.mxu1 %v2549_v50 }
 0x2c2   : > { %2213 = vrcp.f32 %v1078_v20  ;;  %v1079_v24 = vadd.f32 1.0, %v2208_v21 }
 0x2c3   : > { %2215 = vrcp.f32 %v1081_v22 }
 0x2c4   : > { %2217 = vrcp.f32 %v1079_v24  ;;  %2000 = vmatpush3.bf16.msra.mxu1 %v2186_v53  ;;  %v2191_v53 = vld [vmem:[%s3199_s15 + $0x30] sm:$0xff]  }
 0x2c5   : > { %2219 = vpow2.f32 %v1835_v23  ;;  %2001 = vmatprep.subr.bf16.mxu1 %v2549_v50 }
 0x2c6   : > { %2221 = vpow2.f32 %v1836_v25 }
 0x2ca   : > { %v2210_v26 = vpop.eup %2209 }
 0x2cb   : > { %v2212_v27 = vpop.eup %2211  ;;  %v1084_v29 = vadd.f32 1.0, %v2210_v26 }
 0x2cc   : > { %v2214_v28 = vpop.eup %2213  ;;  %v1101_v32 = vmul.f32 %v2212_v27, %v1052_v54  ;;  %v2187_v54 = vld [vmem:[%s3199_s15 + $0x10] sm:$0xff]  }
 0x2cd   : > { %v2216_v30 = vpop.eup %2215  ;;  %v1099_v35 = vmul.f32 %v2214_v28, %v1050_v56  ;;  %2223 = vrcp.f32 %v1084_v29  ;;  %2002 = vmatpush3.bf16.msra.mxu1 %v2187_v54  ;;  %v2189_v56 = vld [vmem:[%s3199_s15 + $0x20] sm:$0xff]   ;;  %v2192_v54 = vld [vmem:[%s3199_s15 + $0x38] sm:$0xff]  }
 0x2ce   : > { %v2218_v31 = vpop.eup %2217  ;;  %v1102_v33 = vmul.f32 %v2216_v30, %v1053_v59  ;;  %2003 = vmatprep.subr.bf16.mxu1 %v2549_v50 }
 0x2cf   : > { %v2220_v34 = vpop.eup %2219  ;;  %v1100_v36 = vmul.f32 %v2218_v31, %v1051_v62 }
 0x2d0   : > { %v2222_v37 = vpop.eup %2221  ;;  %v1082_v38 = vadd.f32 1.0, %v2220_v34  ;;  %v1107_v39 = vpack.c.bf16 %v1102_v33, %v1101_v32 }
 0x2d1   : > { %v1083_v40 = vadd.f32 1.0, %v2222_v37  ;;  %v1106_v41 = vpack.c.bf16 %v1100_v36, %v1099_v35  ;;  %2004 = vmatpush3.bf16.msra.mxu1 %v2188_v55 }
 0x2d2   : > { %2225 = vrcp.f32 %v1082_v38  ;;  %2005 = vmatprep.subr.bf16.mxu1 %v2549_v50 }
 0x2d3   : > { %2227 = vrcp.f32 %v1083_v40  ;;  %1977 = vmatprep.mubr.bf16.mxu0 %v1106_v41 }
 0x2d4   : > { %1978 = vmatmul.mubr.bf16.vlgmr.msra.gmra.mrb[0].mxu0 %v1107_v39 }
 0x2d5   : > { %2006 = vmatpush3.bf16.msra.mxu1 %v2189_v56 }
 0x2d6   : > { %2007 = vmatprep.subr.bf16.mxu1 %v2549_v50 }
 0x2d7   : > { %v2224_v42 = vpop.eup %2223 }
 0x2d8   : > { %v1105_v45 = vmul.f32 %v2224_v42, %v1056_v11 }
 0x2d9   : > { %2008 = vmatpush3.bf16.msra.mxu1 %v2190_v57  ;;  %v1353_v57 = vsel %vm687_vm0, %v2940_v5, 0.0  ;;  %v2195_v5 = vld [vmem:[%s3201_s16 + $0x10] sm:$0xff]  }
 0x2da   : > { %v1109_v49 = vpack.c.bf16 %v1105_v45, %v1105_v45  ;;  %2009 = vmatprep.subr.bf16.mxu1 %v2549_v50 }
 0x2dc   : > { %v2226_v43 = vpop.eup %2225 }
 0x2dd   : > { %v2228_v44 = vpop.eup %2227  ;;  %v1103_v46 = vmul.f32 %v2226_v43, %v1054_v12  ;;  %2010 = vmatpush3.bf16.msra.mxu1 %v2191_v53 }
 0x2de   : > { %v1104_v47 = vmul.f32 %v2228_v44, %v1055_v18  ;;  %2011 = vmatprep.subr.bf16.mxu1 %v2549_v50 }
 0x2e0   : > { %v1108_v48 = vpack.c.bf16 %v1104_v47, %v1103_v46 }
 0x2e1   : > { %2012 = vmatpush3.bf16.msra.mxu1 %v2192_v54 }
 0x2e2   : > { %1981 = vmatprep.mubr.bf16.mxu0 %v1108_v48 }
 0x2e3   : > { %1982 = vmatmul.mubr.bf16.gmra.mrb[4].mxu0 %v1109_v49 }
 0x2e4   : > { %1993 = vmatprep.mubr.msk.bf16.mxu0 %vm2550_vm3, %v2549_v50 }
 0x33b   : > { %v1350_v55 = vpop.permute.xlu0 %1349 }
 0x3a7   : > { %v1979_v59 = vpop.f32.mrb[0].mxu0 }
 0x3a8   : > { %v1224_v60 = vadd.f32 %v1979_v59, %v1838_v58  ;;  %v1215_v61 = vpop.f32.mrb[1].mxu0 }
 0x3a9   : > { %v1216_v62 = vadd.f32 %v1838_v58, %v1215_v61  ;;  %v1980_v63 = vpop.f32.mrb[2].mxu0 }
 0x3aa   : > { %v1849_v0 = vmul.f32 -1.442695, %v1224_v60  ;;  %v1227_v1 = vadd.f32 %v1980_v63, %v1838_v58  ;;  %v1218_v2 = vpop.f32.mrb[3].mxu0 }
 0x3ab   : > { %v1847_v3 = vmul.f32 -1.442695, %v1216_v62  ;;  %v1219_v4 = vadd.f32 %v1838_v58, %v1218_v2  ;;  %v2196_v2 = vld [vmem:[%s3201_s16 + $0x18] sm:$0xff]  }
 0x3ac   : > { %2229 = vpow2.f32 %v1849_v0  ;;  %v1850_v6 = vmul.f32 -1.442695, %v1227_v1  ;;  %v2193_v0 = vld [vmem:[%s3201_s16] sm:$0xff]  }
 0x3ad   : > { %2231 = vpow2.f32 %v1847_v3  ;;  %v1848_v7 = vmul.f32 -1.442695, %v1219_v4  ;;  %v2197_v3 = vld [vmem:[%s3201_s16 + $0x20] sm:$0xff]  }
 0x3ae   : > { %2233 = vpow2.f32 %v1850_v6  ;;  %v2199_v6 = vld [vmem:[%s3201_s16 + $0x30] sm:$0xff]  }
 0x3af   : > { %2235 = vpow2.f32 %v1848_v7  ;;  %v2200_v7 = vld [vmem:[%s3201_s16 + $0x38] sm:$0xff]  }
 0x3b6   : > { %v2230_v8 = vpop.eup %2229  ;;  %v1983_v9 = vpop.f32.mrb[4].mxu0 }
 0x3b7   : > { %v2232_v10 = vpop.eup %2231  ;;  %v1268_v11 = vadd.f32 1.0, %v2230_v8  ;;  %v1240_v12 = vadd.f32 %v1983_v9, %v1838_v58  ;;  %v1231_v13 = vpop.f32.mrb[5].mxu0  ;;  %v1855_v8 = vld [vmem:[#allocation13] ss:$0 sm:$0xff] }
 0x3b8   : > { %v2234_v14 = vpop.eup %2233  ;;  %v1266_v15 = vadd.f32 1.0, %v2232_v10  ;;  %v1232_v16 = vadd.f32 %v1838_v58, %v1231_v13  ;;  %v1984_v17 = vpop.f32.mrb[6].mxu0 }
 0x3b9   : > { %v2236_v18 = vpop.eup %2235  ;;  %2237 = vrcp.f32 %v1268_v11  ;;  %v1269_v19 = vadd.f32 1.0, %v2234_v14  ;;  %v1853_v20 = vmul.f32 -1.442695, %v1240_v12  ;;  %v1234_v21 = vpop.f32.mrb[7].mxu0 }
 0x3ba   : > { %2239 = vrcp.f32 %v1266_v15  ;;  %v1267_v22 = vadd.f32 1.0, %v2236_v18  ;;  %v1851_v23 = vmul.f32 -1.442695, %v1232_v16  ;;  %v1235_v24 = vadd.f32 %v1838_v58, %v1234_v21 }
 0x3bb   : > { %2241 = vrcp.f32 %v1269_v19  ;;  %v1865_v19 = vld [vmem:[%s3202_s2] ss:$0 sm:$0xff] }
 0x3bc   : > { %2243 = vrcp.f32 %v1267_v22  ;;  %v1852_v25 = vmul.f32 -1.442695, %v1235_v24 }
 0x3bd   : > { %2245 = vpow2.f32 %v1853_v20 }
 0x3be   : > { %2247 = vpow2.f32 %v1851_v23 }
 0x3bf   : > { %2249 = vpow2.f32 %v1852_v25 }
 0x3c3   : > { %v2238_v26 = vpop.eup %2237 }
 0x3c4   : > { %v2240_v27 = vpop.eup %2239  ;;  %v1289_v28 = vmul.f32 %v2238_v26, %v1224_v60 }
 0x3c5   : > { %v2242_v29 = vpop.eup %2241  ;;  %v1287_v30 = vmul.f32 %v2240_v27, %v1216_v62 }
 0x3c6   : > { %v2244_v31 = vpop.eup %2243  ;;  %1590 = vst [vmem:[%s3029_s29 + $0x10] sm:$0xff] %v1289_v28  ;;  %v1290_v32 = vmul.f32 %v2242_v29, %v1227_v1  ;;  %v2194_v1 = vld [vmem:[%s3201_s16 + $0x8] sm:$0xff]  }
 0x3c7   : > { %v2246_v33 = vpop.eup %2245  ;;  %1588 = vst [vmem:[%s3029_s29] sm:$0xff] %v1287_v30  ;;  %v1288_v34 = vmul.f32 %v2244_v31, %v1219_v4  ;;  %v2198_v4 = vld [vmem:[%s3201_s16 + $0x28] sm:$0xff]  }
 0x3c8   : > { %v2248_v35 = vpop.eup %2247  ;;  %v1296_v36 = vpack.c.bf16 %v1290_v32, %v1289_v28  ;;  %1591 = vst [vmem:[%s3029_s29 + $0x18] sm:$0xff] %v1290_v32  ;;  %v1272_v37 = vadd.f32 1.0, %v2246_v33 }
 0x3c9   : > { %v2250_v38 = vpop.eup %2249  ;;  %v1295_v39 = vpack.c.bf16 %v1288_v34, %v1287_v30  ;;  %1589 = vst [vmem:[%s3029_s29 + $0x8] sm:$0xff] %v1288_v34  ;;  %v1270_v40 = vadd.f32 1.0, %v2248_v35 }
 0x3ca   : > { %2251 = vrcp.f32 %v1272_v37  ;;  %v1271_v41 = vadd.f32 1.0, %v2250_v38 }
 0x3cb   : > { %2253 = vrcp.f32 %v1270_v40  ;;  %1986 = vmatpush3.bf16.msra.mxu0 %v1295_v39 }
 0x3cc   : > { %2255 = vrcp.f32 %v1271_v41  ;;  %1987 = vmatprep.subr.bf16.mxu0 %v2549_v50 }
 0x3cf   : > { %1988 = vmatpush3.bf16.msra.mxu0 %v1296_v36 }
 0x3d0   : > { %1989 = vmatprep.subr.bf16.mxu0 %v2549_v50 }
 0x3d4   : > { %v2252_v42 = vpop.eup %2251 }
 0x3d5   : > { %v2254_v43 = vpop.eup %2253  ;;  %v1293_v44 = vmul.f32 %v2252_v42, %v1240_v12 }
 0x3d6   : > { %v2256_v45 = vpop.eup %2255  ;;  %v1291_v46 = vmul.f32 %v2254_v43, %v1232_v16 }
 0x3d7   : > { %1594 = vst [vmem:[%s3029_s29 + $0x30] sm:$0xff] %v1293_v44  ;;  %v1292_v47 = vmul.f32 %v2256_v45, %v1235_v24  ;;  %v1298_v49 = vpack.c.bf16 %v1293_v44, %v1293_v44 }
 0x3d8   : > { %1592 = vst [vmem:[%s3029_s29 + $0x20] sm:$0xff] %v1291_v46 }
 0x3d9   : > { %v1297_v48 = vpack.c.bf16 %v1292_v47, %v1291_v46  ;;  %1593 = vst [vmem:[%s3029_s29 + $0x28] sm:$0xff] %v1292_v47  ;;  %v1304_v51 = vsel %vm871_vm2, %v1298_v49, 0  ;;  %s2551_s29 = smov [#allocation14]  }
 0x3da   : > { %s2463_s2 = sshll.u32 %s2551_s29, 4  ;;  %s2464_s2 = int_to_ptr.vmem [resolvable:$false] %s2463_s2 }
 0x3db   : > { %1990 = vmatpush3.bf16.msra.mxu0 %v1297_v48  ;;  %s2465_s26 = scalar_lea.vmem %s2464_s2, 256  ;;  %p2466_p0 = scmp.lt.s32.totalorder %s3096_s25, %s2464_s2 }
 0x3dc   : > { %1991 = vmatprep.subr.bf16.mxu0 %v2549_v50  ;;  %p2467_p2 = scmp.lt.s32.totalorder %s2465_s26, %s2459_s17 }
 0x3de   : > { %p2468_p3 = por %p2467_p2, %p2466_p0 }
 0x3df   : > { %1992 = vmatpush3.bf16.msra.mxu0 %v1304_v51 }
 0x3e0   : > { %2017 = vmatprep.subr.bf16.mxu0 %v2549_v50  ;;  %p2469_p4 = pnand %p2468_p3, %p2462_p13 }
 0x3e2   : > { %1994 = vmatmul.mubr.msk.bf16.vlgmr.msra.gmra.mrb[8].mxu0 %vm1299_vm4, %v1294_v52 }
 0x3e3   : > { %2033 = vmatprep.mubr.msk.bf16.mxu0 %vm2550_vm3, %v2549_v50  ;;  %2018 = vmatpush3.bf16.msra.mxu0 %v2193_v0 }
 0x3e4   : > { %2019 = vmatprep.subr.bf16.mxu0 %v2549_v50 }
 0x3e7   : > { %2020 = vmatpush3.bf16.msra.mxu0 %v2194_v1 }
 0x3e8   : > { %2021 = vmatprep.subr.bf16.mxu0 %v2549_v50 }
 0x3eb   : > { %2022 = vmatpush3.bf16.msra.mxu0 %v2195_v5 }
 0x3ec   : > { %2023 = vmatprep.subr.bf16.mxu0 %v2549_v50 }
 0x3ef   : > { %2024 = vmatpush3.bf16.msra.mxu0 %v2196_v2 }
 0x3f0   : > { %2025 = vmatprep.subr.bf16.mxu0 %v2549_v50 }
 0x3f3   : > { %2026 = vmatpush3.bf16.msra.mxu0 %v2197_v3 }
 0x3f4   : > { %2027 = vmatprep.subr.bf16.mxu0 %v2549_v50 }
 0x3f7   : > { %2028 = vmatpush3.bf16.msra.mxu0 %v2198_v4 }
 0x3f8   : > { %2029 = vmatprep.subr.bf16.mxu0 %v2549_v50 }
 0x3fb   : > { %2030 = vmatpush3.bf16.msra.mxu0 %v2199_v6 }
 0x3fc   : > { %2031 = vmatprep.subr.bf16.mxu0 %v2549_v50 }
 0x3ff   : > { %2032 = vmatpush3.bf16.msra.mxu0 %v2200_v7 }
 0x4b5   : > { %v1340_v56 = vpop.f32.mrb[8].mxu0 }
 0x4b6   : > { %v1352_v58 = vmul.f32 %v1350_v55, %v1340_v56  ;;  %v1995_v59 = vpop.f32.mrb[9].mxu0 }
 0x4b7   : > { %v1343_v60 = vpop.f32.mrb[10].mxu0 }
 0x4b8   : > { %v1354_v61 = vadd.f32 %v1353_v57, %v1352_v58  ;;  %v1996_v62 = vpop.f32.mrb[11].mxu0 }
 0x4ba   : > { %v1355_v63 = vpack.c.bf16 %v1354_v61, %v1354_v61 }
 0x4bc   : > { %2014 = vmatmul.mubr.bf16.vlgmr.msra.gmra.mrb[20].mxu1 %v1355_v63 }
 0x58f   : > { %v1461_v9 = vpop.f32.mrb[20].mxu1 }
 0x590   : > { %v1462_v10 = vadd.f32 %v1855_v8, %v1461_v9  ;;  %v2015_v11 = vpop.f32.mrb[21].mxu1 }
 0x591   : > { %v1464_v12 = vpop.f32.mrb[22].mxu1 }
 0x592   : > { %v1864_v13 = vmul.f32 -1.442695, %v1462_v10  ;;  %v2016_v14 = vpop.f32.mrb[23].mxu1 }
 0x594   : > { %2257 = vpow2.f32 %v1864_v13 }
 0x59e   : > { %v2258_v15 = vpop.eup %2257 }
 0x59f   : > { %v1470_v16 = vadd.f32 1.0, %v2258_v15 }
 0x5a1   : > { %2259 = vrcp.f32 %v1470_v16 }
 0x5ab   : > { %v2260_v17 = vpop.eup %2259 }
 0x5ac   : > { %v1473_v50 = vmul.f32 %v2260_v17, %v1462_v10 }
 0x5ae   : > { %v1474_v18 = vpack.c.bf16 %v1473_v50, %v1473_v50 }
 0x5b0   : > { %2034 = vmatmul.mubr.bf16.vlgmr.msra.gmra.mrb[12].mxu0 %v1474_v18 }
 0x683   : > { %v1580_v20 = vpop.f32.mrb[12].mxu0 }
 0x684   : > { %v1581_v21 = vadd.f32 %v1865_v19, %v1580_v20  ;;  %v2035_v22 = vpop.f32.mrb[13].mxu0 }
 0x685   : > { %v1583_v23 = vpop.f32.mrb[14].mxu0 }
 0x686   : > { %v1586_v24 = vadd.f32 %v1581_v21, %v1354_v61  ;;  %v2036_v25 = vpop.f32.mrb[15].mxu0 }
 0x688   : > { %1587 = vst [vmem:[%s631_s5] sm:$0xff] %v1586_v24 }
 0x689   : > { %2472 = shalt.err (!%p2469_p4)
}
 0x68a   : > { %s2473_s3 = scalar_lea.hbm %s3094_s20, 128  ;;  %s2477_s11 = scalar_lea.hbm %s3204_s4, 256 }
 0x68b   : > { %p2474_p10 = scmp.ne.s32.totalorder %s3094_s20, %s2473_s3  ;;  %p2478_p5 = scmp.lt.u32.totalorder %s3094_s20, %s3204_s4 }
 0x68c   : > { %p2479_p7 = scmp.lt.u32.totalorder %s2477_s11, %s2473_s3  ;;  %p2481_p9 = scmp.lt.u32.totalorder %s2473_s3, %s3094_s20 }
 0x68d   : > { %p2475_p11 = pnand %p2474_p10, %p3205_p12 }
 0x68e   : > { %p2480_p6 = por %p2479_p7, %p2478_p5 }
 0x68f   : > { %p2476_p8 = pneg %p2475_p11 }
 0x690   : > { %p2482_p1 = por %p2481_p9, %p2480_p6 }
 0x692   : > { %p2483_p13 = pnand %p2482_p1, %p2476_p8 }
 0x694   : > { %2486 = shalt.err (!%p2483_p13)
}
 0x695   : > { %2074 = dma.vmem_to_hbm [thread:$0]  (%p3205_p12), %s3096_s25, 128, %s3094_s20, %s1596_s27  }
 0x696 PF: > { %s1629_s17 = sand.u32 1, %s2525_s21   ;;  %p3206_p0 = scmp.ne.s32.totalorder %s3187_s30, 0 }
 0x697   : > { %p3207_p2 = scmp.ge.s32.totalorder %s2537_s24, 2  ;;  %s1630_s2 = scalar_lea.sflag [#allocation4], %s1629_s17 }
 0x699   : > { %p2100_p3 = pnand %p3207_p2, %p3206_p0 }
 0x69b   : > { %2520 = dma.done.wait (!%p2100_p3), %s1630_s2, 128  }
 0x69c   : > { %2522 = vsyncadd (!%p2100_p3), %s1630_s2, 4294967168  ;;  %p33_p4 = scmp.ge.s32.totalorder %s2820_s0, 4   ;;  %s3208_s21 = smov %s2529_s22 }
 0x69d   : > { %s3209_s22 = smov %s2533_s23  ;;  %s3210_s23 = smov %s2831_s19 }
 0x69e   : > { %s3211_s24 = smov %s2820_s0  ;;  %35 = sbr.rel (!%p33_p4) target bundleno = 20 (0x14), region = 164 }
 0x6a5   :  { %1643 = vsyncpa [#allocation3], 1 }
 0x6a6   :  { %1645 = vsyncpa [#allocation3 + $0x1], 1 }
 0x6a7   :  { %1646 = vsyncpa [#allocation6], 1 }
 0x6a8   :  { %1647 = vsyncpa [#allocation9], 1 }
 0x6a9   :  { %1648 = vsyncpa [#allocation12], 1 }
 0x6aa   :  { %1649 = vsyncpa [#allocation4], 1 }
 0x6ab   :  { %1651 = vsyncpa [#allocation4 + $0x1], 1 }

</bundles_post_ra>
